<compile_context>
chip_gen: v7x
topology: tpu7x:2x2x1
jax: 0.10.0
libtpu: 0.0.40
codegen_flags: <defaults>
</compile_context>

<pallas_src>
import functools

import jax
import jax.numpy as jnp
from jax.experimental import pallas as pl
from jax.experimental.pallas import tpu as pltpu

_LANE = 128                    # vreg lane width (last-dim quantum)
_MAX_BLOCK_BYTES = 8 << 20     # hard per-block cap (4 buffers -> <=32 MiB VMEM)


def _sublane(dtype) -> int:
    """Sublane quantum: 8 rows of 32-bit; sub-32-bit dtypes pack 2x/4x."""
    return max(8, 32 // jnp.dtype(dtype).itemsize)


def _default_block_bytes() -> int:
    """Per-generation target block size (input tile; output tile matches)."""
    try:
        info = pltpu.get_tpu_info()
        vmem = getattr(info, "vmem_capacity_bytes", None)
        if vmem is None:
            vmem = getattr(info, "vmem_size_bytes", None)
        if vmem is not None and vmem <= (80 << 20):
            # v7x-class (64 MiB VMEM, ~3.2 TB/s HBM): a 2 MiB block streams in
            # ~1.3 us, so the ~0.35 us/step grid overhead is ~25% unless blocks
            # are larger.  6 MiB amortizes it with plenty of headroom.
            return 6 << 20
    except Exception:
        pass
    # v5e / v6e (128 MiB physical VMEM): 4 MiB is already past the measured
    # roofline knee (512-row tile -> ~85%); larger buys little.
    return 4 << 20


def _rescale_kernel(x_ref, o_ref, *, bias, scale):
    # Pure VPU elementwise op on the whole VMEM tile.  bias/scale are Python
    # floats (weakly typed), so the math stays in x's dtype.
    o_ref[...] = (x_ref[...] + bias) * scale


def _pick_block_rows(rows, cols, itemsize, sub, target_block_bytes):
    """Largest sublane-aligned row tile <= rows fitting the byte target.

    Does NOT need to divide rows: the caller uses grid = cdiv(rows, tr) and
    Pallas masks the ragged last block (fine for an elementwise kernel).
    """
    if rows <= sub:
        return rows                                     # full extent, always legal
    cap = max(sub, target_block_bytes // (cols * itemsize))
    cap = (cap // sub) * sub
    return max(sub, min(cap, (rows // sub) * sub))


def _rescale_2d(x2d, scale, bias, *, target_block_bytes, donate_input):
    """(x + bias) * scale on a 2D slab.  cols is either a multiple of 128
    (flattened fast path) or the full last dim of the original array."""
    rows, cols = x2d.shape
    dtype = x2d.dtype
    itemsize = jnp.dtype(dtype).itemsize
    sub = _sublane(dtype)

    tr = _pick_block_rows(rows, cols, itemsize, sub, target_block_bytes)
    grid = (pl.cdiv(rows, tr),)

    block_bytes = tr * cols * itemsize
    # Double-buffered input + output = 4 block-sized buffers; raise the scoped
    # VMEM limit explicitly so this also holds under v5e's 16 MiB default.
    vmem_limit = min(48 << 20, 4 * block_bytes + (8 << 20))

    n = rows * cols
    cost = pl.CostEstimate(
        flops=2 * n,                       # one add + one mul per element
        transcendentals=0,
        bytes_accessed=2 * n * itemsize,   # read x, write out (bandwidth-bound)
    )

    return pl.pallas_call(
        functools.partial(_rescale_kernel, bias=bias, scale=scale),
        out_shape=jax.ShapeDtypeStruct((rows, cols), dtype),
        grid_spec=pltpu.PrefetchScalarGridSpec(
            num_scalar_prefetch=0,
            grid=grid,
            in_specs=[pl.BlockSpec((tr, cols), lambda i: (i, 0))],
            out_specs=pl.BlockSpec((tr, cols), lambda i: (i, 0)),
        ),
        compiler_params=pltpu.CompilerParams(
            # TODO(synk): verify via xprof that a plain "parallel" axis is
            # sharded across both v7x TensorCores; if not, switch this axis to
            # pltpu.CORE_PARALLEL.
            dimension_semantics=("parallel",),
            vmem_limit_bytes=vmem_limit,
        ),
        cost_estimate=cost,
        input_output_aliases={0: 0} if donate_input else {},
    )(x2d)


def constant_rescale(x, scale: float, bias: float, *,
                     target_block_bytes=None, donate_input: bool = False):
    """(x + bias) * scale, computed in a Pallas TPU kernel.

    x: any-shaped floating-point array (e.g. NCHW activations).
    donate_input=True only marks the pallas output as aliasing the input; the
    caller must ALSO donate x at its jax.jit boundary (donate_argnums) and must
    not read x afterwards for the HBM buffer to actually be reused.
    """
    dtype = x.dtype
    if not jnp.issubdtype(dtype, jnp.floating):
        raise TypeError(
            f"constant_rescale expects a floating dtype, got {dtype}; integer "
            "inputs would promote under (x + bias) * scale.")

    orig_shape = x.shape
    n = x.size
    if n == 0:
        return x
    if target_block_bytes is None:
        target_block_bytes = _default_block_bytes()

    itemsize = jnp.dtype(dtype).itemsize
    sub = _sublane(dtype)

    if n % _LANE == 0:
        # Zero-copy fast path: flatten to a lane-dense slab.  Prefer a width
        # whose row count is also sublane-aligned (every block, incl. the last,
        # stays unmasked); otherwise any 128-multiple width works, since the
        # cdiv grid masks the ragged tail block.
        cols = None
        for c in (4096, 2048, 1024, 512, 256, 128):
            if n % (c * sub) == 0:
                cols = c
                break
        if cols is None:
            for c in (4096, 2048, 1024, 512, 256, 128):
                if n % c == 0:
                    cols = c
                    break
        rows = n // cols
        out2d = _rescale_2d(x.reshape(rows, cols), scale, bias,
                            target_block_bytes=target_block_bytes,
                            donate_input=donate_input)
        return out2d.reshape(orig_shape)

    # Unaligned total size: keep the last dim intact (full-extent block dim),
    # merge all leading dims (layout-preserving reshape, no copy), and tile
    # the leading axis.  1x read + 1x write of HBM; no pad / slice copies.
    if x.ndim >= 2:
        rows, cols = n // orig_shape[-1], orig_shape[-1]
    else:
        rows, cols = 1, n
    if min(rows, sub) * cols * itemsize > _MAX_BLOCK_BYTES:
        # TODO(synk): a single row of trailing dims exceeds the VMEM block
        # budget; no clean copy-free tiling -> plain XLA elementwise fallback.
        return (x + bias) * scale
    out2d = _rescale_2d(x.reshape(rows, cols), scale, bias,
                        target_block_bytes=target_block_bytes,
                        donate_input=donate_input)
    return out2d.reshape(orig_shape)


if __name__ == "__main__":
    # Module "parameters": constants from __init__ (deterministic, in-script).
    scale = 2.5
    bias = -0.75

    key = jax.random.PRNGKey(0)
    k1, k2, k3 = jax.random.split(key, 3)

    # NCHW f32 input -> aligned zero-copy fast path.
    x = jax.random.normal(k1, (2, 4, 16, 16), dtype=jnp.float32)
    out = jax.block_until_ready(constant_rescale(x, scale, bias))
    ref = (x + bias) * scale
    assert out.shape == x.shape and out.dtype == x.dtype
    assert jnp.allclose(out, ref, atol=1e-6, rtol=1e-6)

    # bf16 input exercises the dtype-aware sublane quantum (16-row tiles).
    xb = jax.random.normal(k2, (2, 4, 16, 16), dtype=jnp.bfloat16)
    out_b = jax.block_until_ready(constant_rescale(xb, scale, bias))
    ref_b = (xb + bias) * scale
    assert out_b.shape == xb.shape and out_b.dtype == xb.dtype
    assert jnp.allclose(out_b.astype(jnp.float32), ref_b.astype(jnp.float32),
                        atol=1e-2, rtol=1e-2)

    # Unaligned shape exercises the copy-free ragged-tile path (cdiv grid).
    y = jax.random.normal(k3, (3, 5, 7), dtype=jnp.float32)
    out_y = jax.block_until_ready(constant_rescale(y, scale, bias))
    assert out_y.shape == y.shape and out_y.dtype == y.dtype
    assert jnp.allclose(out_y, (y + bias) * scale, atol=1e-6, rtol=1e-6)

    print("KERNEL_OK")
</pallas_src>

<mosaic_0001>
module attributes {stable_mosaic.version = 11 : i64} {
  func.func @_rescale_kernel(%arg0: i32, %arg1: memref<8x256xf32, #tpu.memory_space<vmem>>, %arg2: memref<8x256xf32, #tpu.memory_space<vmem>>) attributes {dimension_semantics = [#tpu.dimension_semantics<parallel>], iteration_bounds = array<i64: 1>, scalar_prefetch = 0 : i64, scratch_operands = 0 : i64, tpu.core_type = #tpu.core_type<tc>, window_params = [{transform_indices = @transform_0, window_bounds = array<i64: 8, 256>}, {transform_indices = @transform_1, window_bounds = array<i64: 8, 256>}]} {
    %c0 = arith.constant 0 : index
    %c0_0 = arith.constant 0 : index
    %0 = vector.load %arg1[%c0, %c0_0] : memref<8x256xf32, #tpu.memory_space<vmem>>, vector<8x256xf32>
    %cst = arith.constant -7.500000e-01 : f32
    %1 = vector.broadcast %cst : f32 to vector<8x256xf32>
    %2 = arith.addf %0, %1 : vector<8x256xf32>
    %cst_1 = arith.constant 2.500000e+00 : f32
    %3 = vector.broadcast %cst_1 : f32 to vector<8x256xf32>
    %4 = arith.mulf %2, %3 : vector<8x256xf32>
    %c0_2 = arith.constant 0 : index
    %c0_3 = arith.constant 0 : index
    %5 = vector.load %arg2[%c0_2, %c0_3] : memref<8x256xf32, #tpu.memory_space<vmem>>, vector<8x256xf32>
    tpu.vector_store %arg2[%c0_2, %c0_3], %4 {strides = array<i32>} : memref<8x256xf32, #tpu.memory_space<vmem>>, vector<8x256xf32>,
    return
  }
  func.func @transform_0(%arg0: i32) -> (i32, i32) {
    %c0_i32 = arith.constant 0 : i32
    %c0_i32_0 = arith.constant 0 : i32
    return %arg0, %c0_i32 : i32, i32
  }
  func.func @transform_1(%arg0: i32) -> (i32, i32) {
    %c0_i32 = arith.constant 0 : i32
    %c0_i32_0 = arith.constant 0 : i32
    return %arg0, %c0_i32 : i32, i32
  }
}

</mosaic_0001>

<bundles_post_ra>
// kernel: tpu_custom_call.1
= control target key start
LH: loop header
LB: loop body
LE: loop exit
PB: predicated region body
PF: predicated region fallthrough
CT: control target
= control target key end

     0   :  { %6 = vsyncpa [#allocation3], 0  ;;  %s130_s0 = inlined_call_operand.hbm [shape: f32[8,256], index: 0, kind: input, shape index: {}]   ;;  %s131_s1 = inlined_call_operand.hbm [shape: f32[8,256], index: 1, kind: output, shape index: {}]  }
   0x1   :  { %7 = vsyncpa [#allocation4], 0  ;;  %s94_s6 = smov [#allocation2]   ;;  %s46_s10 = scalar_lea.hbm %s130_s0, 256 }
   0x2   :  { %s14_s7 = sshll.u32 %s94_s6, 4  ;;  %p47_p0 = scmp.ne.s32.totalorder %s130_s0, %s46_s10  ;;  %s15_s7 = int_to_ptr.vmem [resolvable:$true] %s14_s7 }
   0x3   :  { %p50_p1 = scmp.lt.u32.totalorder %s46_s10, %s130_s0 }
   0x5   :  { %p52_p2 = pnand %p50_p1, %p47_p0 }
   0x7   :  { %55 = shalt.err (!%p52_p2)
}
   0x8   :  { %s56_s15 = scalar_lea.vmem %s15_s7, 256  ;;  %p61_p4 = scmp.lt.s32.totalorder %s15_s7, %s15_s7 }
   0x9   :  { %p57_p3 = scmp.ne.s32.totalorder %s15_s7, %s56_s15  ;;  %p62_p5 = scmp.lt.s32.totalorder %s56_s15, %s56_s15 }
   0xb   :  { %p63_p6 = por %p62_p5, %p61_p4 }
   0xd   :  { %p64_p7 = pnand %p63_p6, %p57_p3 }
   0xf   :  { %67 = shalt.err (!%p64_p7)
}
  0x10   :  { %17 = dma.hbm_to_vmem [thread:$0]  %s130_s0, 256, %s15_s7, [#allocation3]  }
  0x11   :  { %90 = dma.done.wait [#allocation3], 256  }
  0x12   :  { %91 = vsyncadd [#allocation3], 4294967040  ;;  %v21_v0 = vld [vmem:[#allocation2] sm:$0xff]  ;;  %v22_v1 = vld [vmem:[#allocation2 + $0x8] sm:$0xff]  ;;  %s95_s18 = smov [#allocation5]  }
  0x13   :  { %s35_s19 = sshll.u32 %s95_s18, 4  ;;  %v23_v2 = vadd.f32 -0.75, %v21_v0  ;;  %v24_v3 = vadd.f32 -0.75, %v22_v1  ;;  %s36_s19 = int_to_ptr.vmem [resolvable:$true] %s35_s19 }
  0x14   :  { %s68_s20 = scalar_lea.vmem %s36_s19, 256  ;;  %p73_p9 = scmp.lt.s32.totalorder %s36_s19, %s36_s19 }
  0x15   :  { %v25_v4 = vmul.f32 2.5, %v23_v2  ;;  %v26_v5 = vmul.f32 2.5, %v24_v3  ;;  %p69_p8 = scmp.ne.s32.totalorder %s36_s19, %s68_s20  ;;  %p74_p10 = scmp.lt.s32.totalorder %s68_s20, %s68_s20 }
  0x17   :  { %27 = vst [vmem:[#allocation5] sm:$0xff] %v25_v4  ;;  %28 = vst [vmem:[#allocation5 + $0x8] sm:$0xff] %v26_v5  ;;  %p75_p11 = por %p74_p10, %p73_p9 }
  0x19   :  { %p76_p12 = pnand %p75_p11, %p69_p8 }
  0x1b   :  { %79 = shalt.err (!%p76_p12)
}
  0x1c   :  { %s80_s22 = scalar_lea.hbm %s131_s1, 256 }
  0x1d   :  { %p81_p13 = scmp.ne.s32.totalorder %s131_s1, %s80_s22  ;;  %p84_p0 = scmp.lt.u32.totalorder %s80_s22, %s131_s1 }
  0x1f   :  { %p86_p1 = pnand %p84_p0, %p81_p13 }
  0x21   :  { %89 = shalt.err (!%p86_p1)
}
  0x22   :  { %38 = dma.vmem_to_hbm [thread:$0]  %s36_s19, 256, %s131_s1, [#allocation4]  }
  0x23   :  { %92 = dma.done.wait [#allocation4], 256  }
  0x24   :  { %93 = vsyncadd [#allocation4], 4294967040 }
  0x25   :  { %42 = vsyncpa [#allocation3], 1 }
  0x26   :  { %43 = vsyncpa [#allocation4], 1 }

</bundles_post_ra>
